<compile_context>
chip_gen: v6e
topology: v6e:2x2x1
jax: 0.10.0
libtpu: 0.0.40
codegen_flags: <defaults>
</compile_context>

<pallas_src>
import jax
import jax.numpy as jnp
from jax.experimental import pallas as pl
from jax.experimental.pallas import tpu as pltpu

INPUT_DIM = 300     # matches the module default
COLOR_DIM = 3
OUTPUT_DIM = 3
HIDDEN_1 = 32
HIDDEN_2 = 16


def _round_up(x, m):
    return ((x + m - 1) // m) * m


def hsc19_hsv_kernel(emb1_ref, emb2_ref, c_ref,
                     w1a_ref, w1b_ref, w1c_ref, b1_ref,
                     w2_ref, b2_ref,
                     wm_ref, bm_ref,
                     wh_ref, bh_ref,
                     out_ref):
    c = c_ref[...]                                          # (TB, 3)

    # color_fc1 + Sigmoid, with the concat folded into three partial matmuls
    pre1 = (jnp.dot(emb1_ref[...], w1a_ref[...], preferred_element_type=jnp.float32)
            + jnp.dot(emb2_ref[...], w1b_ref[...], preferred_element_type=jnp.float32)
            + jnp.dot(c, w1c_ref[...], preferred_element_type=jnp.float32)
            + b1_ref[...])
    x1 = jax.nn.sigmoid(pre1)                               # (TB, 32)

    # color_fc2 + Sigmoid
    x2 = jax.nn.sigmoid(
        jnp.dot(x1, w2_ref[...], preferred_element_type=jnp.float32) + b2_ref[...])  # (TB, 16)

    # three mixing heads fused into one (16, 9) matmul + one sigmoid
    m = jax.nn.sigmoid(
        jnp.dot(x2, wm_ref[...], preferred_element_type=jnp.float32) + bm_ref[...])  # (TB, 9)
    m1 = m[:, 0:3]
    m2 = m[:, 3:6]
    m3 = m[:, 6:9]

    # bmm(stack([m1,m2,m3], dim=1), color.unsqueeze(-1)) -> row-wise dot products
    mr1 = jnp.sum(m1 * c, axis=-1, keepdims=True)           # (TB, 1)
    mr2 = jnp.sum(m2 * c, axis=-1, keepdims=True)           # (TB, 1)
    mr3 = jnp.sum(m3 * c, axis=-1, keepdims=True)           # (TB, 1)

    # h = Sigmoid(Linear(1,1)(mr[:, 0]));  sv = mr[:, 1:]
    h = jax.nn.sigmoid(mr1 * wh_ref[0, 0] + bh_ref[0, 0])   # (TB, 1)

    # single lane-contiguous output: [h | mr2 | mr3]
    out_ref[...] = jnp.concatenate([h, mr2, mr3], axis=-1)  # (TB, 3)


def make_params(key):
    """Deterministic synthetic parameters (torch Linear shapes, stored as (in, out))."""
    d_in = 2 * INPUT_DIM + COLOR_DIM
    keys = jax.random.split(key, 12)
    scale = 0.1
    p = {
        "w1":  scale * jax.random.normal(keys[0], (d_in, HIDDEN_1), jnp.float32),
        "b1":  scale * jax.random.normal(keys[1], (1, HIDDEN_1), jnp.float32),
        "w2":  scale * jax.random.normal(keys[2], (HIDDEN_1, HIDDEN_2), jnp.float32),
        "b2":  scale * jax.random.normal(keys[3], (1, HIDDEN_2), jnp.float32),
        "wm1": scale * jax.random.normal(keys[4], (HIDDEN_2, OUTPUT_DIM), jnp.float32),
        "bm1": scale * jax.random.normal(keys[5], (1, OUTPUT_DIM), jnp.float32),
        "wm2": scale * jax.random.normal(keys[6], (HIDDEN_2, OUTPUT_DIM), jnp.float32),
        "bm2": scale * jax.random.normal(keys[7], (1, OUTPUT_DIM), jnp.float32),
        "wm3": scale * jax.random.normal(keys[8], (HIDDEN_2, OUTPUT_DIM), jnp.float32),
        "bm3": scale * jax.random.normal(keys[9], (1, OUTPUT_DIM), jnp.float32),
        "wh":  scale * jax.random.normal(keys[10], (1, 1), jnp.float32),
        "bh":  scale * jax.random.normal(keys[11], (1, 1), jnp.float32),
    }
    return p


def hsc19_hsv_forward(emb1, emb2, source_color, params, *, tb=1024):
    emb1 = emb1.astype(jnp.float32)
    emb2 = emb2.astype(jnp.float32)
    source_color = source_color.astype(jnp.float32)
    B = emb1.shape[0]

    # Split the first-layer weight along its input dim so the concat never
    # materializes, and fuse the three mixing heads.
    w1 = params["w1"]
    w1a = w1[:INPUT_DIM, :]                                   # (300, 32)
    w1b = w1[INPUT_DIM:2 * INPUT_DIM, :]                      # (300, 32)
    w1c = w1[2 * INPUT_DIM:, :]                               # (3, 32)
    wm = jnp.concatenate([params["wm1"], params["wm2"], params["wm3"]], axis=1)   # (16, 9)
    bm = jnp.concatenate([params["bm1"], params["bm2"], params["bm3"]], axis=1)   # (1, 9)

    # Batch tiling: TB a multiple of 8 (sublane), pad B up to a multiple of TB.
    TB = min(tb, _round_up(B, 8))
    B_pad = _round_up(B, TB)
    if B_pad != B:
        pad = B_pad - B
        emb1 = jnp.pad(emb1, ((0, pad), (0, 0)))
        emb2 = jnp.pad(emb2, ((0, pad), (0, 0)))
        source_color = jnp.pad(source_color, ((0, pad), (0, 0)))
    grid = (B_pad // TB,)

    batch_spec = lambda cols: pl.BlockSpec((TB, cols), lambda i: (i, 0))
    full_spec = lambda r, c: pl.BlockSpec((r, c), lambda i: (0, 0))
    smem_spec = pl.BlockSpec(memory_space=pltpu.MemorySpace.SMEM)

    in_specs = [
        batch_spec(INPUT_DIM),                # emb1
        batch_spec(INPUT_DIM),                # emb2
        batch_spec(COLOR_DIM),                # source_color
        full_spec(INPUT_DIM, HIDDEN_1),       # w1a
        full_spec(INPUT_DIM, HIDDEN_1),       # w1b
        full_spec(COLOR_DIM, HIDDEN_1),       # w1c
        full_spec(1, HIDDEN_1),               # b1
        full_spec(HIDDEN_1, HIDDEN_2),        # w2
        full_spec(1, HIDDEN_2),               # b2
        full_spec(HIDDEN_2, 3 * OUTPUT_DIM),  # wm (fused heads)
        full_spec(1, 3 * OUTPUT_DIM),         # bm
        smem_spec,                            # wh scalar
        smem_spec,                            # bh scalar
    ]

    out = pl.pallas_call(
        hsc19_hsv_kernel,
        out_shape=jax.ShapeDtypeStruct((B_pad, 3), jnp.float32),
        grid=grid,
        in_specs=in_specs,
        out_specs=pl.BlockSpec((TB, 3), lambda i: (i, 0)),
        compiler_params=pltpu.CompilerParams(
            dimension_semantics=("parallel",)),
    )(emb1, emb2, source_color,
      w1a, w1b, w1c, params["b1"],
      params["w2"], params["b2"],
      wm, bm,
      params["wh"], params["bh"])

    out = out[:B]
    h = out[:, 0:1]
    sv = out[:, 1:3]
    return h, sv


def reference_forward(emb1, emb2, source_color, p):
    """Pure-JAX reference mirroring the PyTorch forward, for verification."""
    x = jnp.concatenate([emb1, emb2, source_color], axis=-1)
    x1 = jax.nn.sigmoid(x @ p["w1"] + p["b1"])
    x2 = jax.nn.sigmoid(x1 @ p["w2"] + p["b2"])
    m1 = jax.nn.sigmoid(x2 @ p["wm1"] + p["bm1"])
    m2 = jax.nn.sigmoid(x2 @ p["wm2"] + p["bm2"])
    m3 = jax.nn.sigmoid(x2 @ p["wm3"] + p["bm3"])
    m = jnp.stack([m1, m2, m3], axis=1)                    # (B, 3, 3)
    r = source_color[:, :, None]                           # (B, 3, 1)
    mr = jnp.einsum("bij,bjk->bik", m, r)                  # (B, 3, 1)
    h = jax.nn.sigmoid(mr[:, 0] * p["wh"][0, 0] + p["bh"][0, 0])   # (B, 1)
    sv = mr[:, 1:, 0]                                      # (B, 2)
    return h, sv


if __name__ == "__main__":
    key = jax.random.PRNGKey(0)
    k_p, k1, k2, k3 = jax.random.split(key, 4)

    params = make_params(k_p)

    # small single-tile case (B=2, padded to one TB=8 tile)
    B = 2
    emb1 = jax.random.normal(k1, (B, INPUT_DIM), jnp.float32)
    emb2 = jax.random.normal(k2, (B, INPUT_DIM), jnp.float32)
    source_color = jax.random.uniform(k3, (B, COLOR_DIM), jnp.float32)

    h, sv = hsc19_hsv_forward(emb1, emb2, source_color, params)
    jax.block_until_ready((h, sv))

    h_ref, sv_ref = reference_forward(emb1, emb2, source_color, params)
    assert h.shape == (B, 1) and sv.shape == (B, 2)
    assert jnp.allclose(h, h_ref, atol=1e-5), "h mismatch vs reference"
    assert jnp.allclose(sv, sv_ref, atol=1e-5), "sv mismatch vs reference"

    # multi-tile / ragged-tail case to exercise the batch grid (B=20, TB=8 -> 3 steps)
    B2 = 20
    k4, k5, k6 = jax.random.split(k3, 3)
    e1b = jax.random.normal(k4, (B2, INPUT_DIM), jnp.float32)
    e2b = jax.random.normal(k5, (B2, INPUT_DIM), jnp.float32)
    cb = jax.random.uniform(k6, (B2, COLOR_DIM), jnp.float32)

    h2, sv2 = hsc19_hsv_forward(e1b, e2b, cb, params, tb=8)
    jax.block_until_ready((h2, sv2))
    h2_ref, sv2_ref = reference_forward(e1b, e2b, cb, params)
    assert h2.shape == (B2, 1) and sv2.shape == (B2, 2)
    assert jnp.allclose(h2, h2_ref, atol=1e-5), "h mismatch vs reference (tiled)"
    assert jnp.allclose(sv2, sv2_ref, atol=1e-5), "sv mismatch vs reference (tiled)"

    print("KERNEL_OK")
</pallas_src>

<mosaic_0001>
module attributes {stable_mosaic.version = 11 : i64} {
  func.func @hsc19_hsv_kernel(%arg0: i32, %arg1: memref<8x300xf32, #tpu.memory_space<vmem>>, %arg2: memref<8x300xf32, #tpu.memory_space<vmem>>, %arg3: memref<8x3xf32, #tpu.memory_space<vmem>>, %arg4: memref<300x32xf32, #tpu.memory_space<vmem>>, %arg5: memref<300x32xf32, #tpu.memory_space<vmem>>, %arg6: memref<3x32xf32, #tpu.memory_space<vmem>>, %arg7: memref<1x32xf32, #tpu.memory_space<vmem>>, %arg8: memref<32x16xf32, #tpu.memory_space<vmem>>, %arg9: memref<1x16xf32, #tpu.memory_space<vmem>>, %arg10: memref<16x9xf32, #tpu.memory_space<vmem>>, %arg11: memref<1x9xf32, #tpu.memory_space<vmem>>, %arg12: memref<1x1xf32, #tpu.memory_space<smem>>, %arg13: memref<1x1xf32, #tpu.memory_space<smem>>, %arg14: memref<8x3xf32, #tpu.memory_space<vmem>>) attributes {dimension_semantics = [#tpu.dimension_semantics<parallel>], iteration_bounds = array<i64: 1>, scalar_prefetch = 0 : i64, scratch_operands = 0 : i64, tpu.core_type = #tpu.core_type<tc>, window_params = [{transform_indices = @transform_0, window_bounds = array<i64: 8, 300>}, {transform_indices = @transform_1, window_bounds = array<i64: 8, 300>}, {transform_indices = @transform_2, window_bounds = array<i64: 8, 3>}, {pipeline_mode = #tpu.pipeline_mode<synchronous>, transform_indices = @transform_3, window_bounds = array<i64: 300, 32>}, {pipeline_mode = #tpu.pipeline_mode<synchronous>, transform_indices = @transform_4, window_bounds = array<i64: 300, 32>}, {pipeline_mode = #tpu.pipeline_mode<synchronous>, transform_indices = @transform_5, window_bounds = array<i64: 3, 32>}, {pipeline_mode = #tpu.pipeline_mode<synchronous>, transform_indices = @transform_6, window_bounds = array<i64: 1, 32>}, {pipeline_mode = #tpu.pipeline_mode<synchronous>, transform_indices = @transform_7, window_bounds = array<i64: 32, 16>}, {pipeline_mode = #tpu.pipeline_mode<synchronous>, transform_indices = @transform_8, window_bounds = array<i64: 1, 16>}, {pipeline_mode = #tpu.pipeline_mode<synchronous>, transform_indices = @transform_9, window_bounds = array<i64: 16, 9>}, {pipeline_mode = #tpu.pipeline_mode<synchronous>, transform_indices = @transform_10, window_bounds = array<i64: 1, 9>}, {transform_indices = @transform_11, window_bounds = array<i64: 1, 1>}, {transform_indices = @transform_12, window_bounds = array<i64: 1, 1>}, {transform_indices = @transform_13, window_bounds = array<i64: 8, 3>}]} {
    %c0 = arith.constant 0 : index
    %c0_0 = arith.constant 0 : index
    %0 = vector.load %arg3[%c0, %c0_0] : memref<8x3xf32, #tpu.memory_space<vmem>>, vector<8x3xf32>
    %c0_1 = arith.constant 0 : index
    %c0_2 = arith.constant 0 : index
    %1 = vector.load %arg1[%c0_1, %c0_2] : memref<8x300xf32, #tpu.memory_space<vmem>>, vector<8x300xf32>
    %c0_3 = arith.constant 0 : index
    %c0_4 = arith.constant 0 : index
    %2 = vector.load %arg4[%c0_3, %c0_4] : memref<300x32xf32, #tpu.memory_space<vmem>>, vector<300x32xf32>
    %cst = arith.constant dense<0.000000e+00> : vector<8x32xf32>
    %3 = tpu.matmul %1, %2, %cst {dimension_numbers = #tpu.dot_dimension_numbers<[1], [0], [0], [1], [0, 0, 1, 1], [], []>} : vector<8x300xf32>, vector<300x32xf32>, vector<8x32xf32> -> vector<8x32xf32>
    %c0_5 = arith.constant 0 : index
    %c0_6 = arith.constant 0 : index
    %4 = vector.load %arg2[%c0_5, %c0_6] : memref<8x300xf32, #tpu.memory_space<vmem>>, vector<8x300xf32>
    %c0_7 = arith.constant 0 : index
    %c0_8 = arith.constant 0 : index
    %5 = vector.load %arg5[%c0_7, %c0_8] : memref<300x32xf32, #tpu.memory_space<vmem>>, vector<300x32xf32>
    %cst_9 = arith.constant dense<0.000000e+00> : vector<8x32xf32>
    %6 = tpu.matmul %4, %5, %cst_9 {dimension_numbers = #tpu.dot_dimension_numbers<[1], [0], [0], [1], [0, 0, 1, 1], [], []>} : vector<8x300xf32>, vector<300x32xf32>, vector<8x32xf32> -> vector<8x32xf32>
    %7 = arith.addf %3, %6 : vector<8x32xf32>
    %c0_10 = arith.constant 0 : index
    %c0_11 = arith.constant 0 : index
    %8 = vector.load %arg6[%c0_10, %c0_11] : memref<3x32xf32, #tpu.memory_space<vmem>>, vector<3x32xf32>
    %cst_12 = arith.constant dense<0.000000e+00> : vector<8x32xf32>
    %9 = tpu.matmul %0, %8, %cst_12 {dimension_numbers = #tpu.dot_dimension_numbers<[1], [0], [0], [1], [0, 0, 1, 1], [], []>} : vector<8x3xf32>, vector<3x32xf32>, vector<8x32xf32> -> vector<8x32xf32>
    %10 = arith.addf %7, %9 : vector<8x32xf32>
    %c0_13 = arith.constant 0 : index
    %c0_14 = arith.constant 0 : index
    %11 = vector.load %arg7[%c0_13, %c0_14] : memref<1x32xf32, #tpu.memory_space<vmem>>, vector<1x32xf32>
    %12 = vector.broadcast %11 : vector<1x32xf32> to vector<8x32xf32>
    %13 = arith.addf %10, %12 : vector<8x32xf32>
    %14 = arith.negf %13 : vector<8x32xf32>
    %15 = math.exp %14 : vector<8x32xf32>
    %cst_15 = arith.constant 1.000000e+00 : f32
    %16 = vector.broadcast %cst_15 : f32 to vector<8x32xf32>
    %17 = arith.addf %16, %15 : vector<8x32xf32>
    %18 = arith.divf %16, %17 : vector<8x32xf32>
    %c0_16 = arith.constant 0 : index
    %c0_17 = arith.constant 0 : index
    %19 = vector.load %arg8[%c0_16, %c0_17] : memref<32x16xf32, #tpu.memory_space<vmem>>, vector<32x16xf32>
    %cst_18 = arith.constant dense<0.000000e+00> : vector<8x16xf32>
    %20 = tpu.matmul %18, %19, %cst_18 {dimension_numbers = #tpu.dot_dimension_numbers<[1], [0], [0], [1], [0, 0, 1, 1], [], []>} : vector<8x32xf32>, vector<32x16xf32>, vector<8x16xf32> -> vector<8x16xf32>
    %c0_19 = arith.constant 0 : index
    %c0_20 = arith.constant 0 : index
    %21 = vector.load %arg9[%c0_19, %c0_20] : memref<1x16xf32, #tpu.memory_space<vmem>>, vector<1x16xf32>
    %22 = vector.broadcast %21 : vector<1x16xf32> to vector<8x16xf32>
    %23 = arith.addf %20, %22 : vector<8x16xf32>
    %24 = arith.negf %23 : vector<8x16xf32>
    %25 = math.exp %24 : vector<8x16xf32>
    %cst_21 = arith.constant 1.000000e+00 : f32
    %26 = vector.broadcast %cst_21 : f32 to vector<8x16xf32>
    %27 = arith.addf %26, %25 : vector<8x16xf32>
    %28 = arith.divf %26, %27 : vector<8x16xf32>
    %c0_22 = arith.constant 0 : index
    %c0_23 = arith.constant 0 : index
    %29 = vector.load %arg10[%c0_22, %c0_23] : memref<16x9xf32, #tpu.memory_space<vmem>>, vector<16x9xf32>
    %cst_24 = arith.constant dense<0.000000e+00> : vector<8x9xf32>
    %30 = tpu.matmul %28, %29, %cst_24 {dimension_numbers = #tpu.dot_dimension_numbers<[1], [0], [0], [1], [0, 0, 1, 1], [], []>} : vector<8x16xf32>, vector<16x9xf32>, vector<8x9xf32> -> vector<8x9xf32>
    %c0_25 = arith.constant 0 : index
    %c0_26 = arith.constant 0 : index
    %31 = vector.load %arg11[%c0_25, %c0_26] : memref<1x9xf32, #tpu.memory_space<vmem>>, vector<1x9xf32>
    %32 = vector.broadcast %31 : vector<1x9xf32> to vector<8x9xf32>
    %33 = arith.addf %30, %32 : vector<8x9xf32>
    %34 = arith.negf %33 : vector<8x9xf32>
    %35 = math.exp %34 : vector<8x9xf32>
    %cst_27 = arith.constant 1.000000e+00 : f32
    %36 = vector.broadcast %cst_27 : f32 to vector<8x9xf32>
    %37 = arith.addf %36, %35 : vector<8x9xf32>
    %38 = arith.divf %36, %37 : vector<8x9xf32>
    %39 = vector.extract_strided_slice %38 {offsets = [0, 0], sizes = [8, 3], strides = [1, 1]} : vector<8x9xf32> to vector<8x3xf32>
    %40 = vector.extract_strided_slice %38 {offsets = [0, 3], sizes = [8, 3], strides = [1, 1]} : vector<8x9xf32> to vector<8x3xf32>
    %41 = vector.extract_strided_slice %38 {offsets = [0, 6], sizes = [8, 3], strides = [1, 1]} : vector<8x9xf32> to vector<8x3xf32>
    %42 = arith.mulf %39, %0 : vector<8x3xf32>
    %cst_28 = arith.constant dense<0.000000e+00> : vector<8xf32>
    %43 = vector.multi_reduction <add>, %42, %cst_28 [1] : vector<8x3xf32> to vector<8xf32>
    %44 = vector.shape_cast %43 : vector<8xf32> to vector<8x1xf32>
    %45 = arith.mulf %40, %0 : vector<8x3xf32>
    %cst_29 = arith.constant dense<0.000000e+00> : vector<8xf32>
    %46 = vector.multi_reduction <add>, %45, %cst_29 [1] : vector<8x3xf32> to vector<8xf32>
    %47 = vector.shape_cast %46 : vector<8xf32> to vector<8x1xf32>
    %48 = arith.mulf %41, %0 : vector<8x3xf32>
    %cst_30 = arith.constant dense<0.000000e+00> : vector<8xf32>
    %49 = vector.multi_reduction <add>, %48, %cst_30 [1] : vector<8x3xf32> to vector<8xf32>
    %50 = vector.shape_cast %49 : vector<8xf32> to vector<8x1xf32>
    %c0_31 = arith.constant 0 : index
    %c0_32 = arith.constant 0 : index
    %51 = memref.load %arg12[%c0_31, %c0_32] : memref<1x1xf32, #tpu.memory_space<smem>>
    %52 = vector.broadcast %51 : f32 to vector<8x1xf32>
    %53 = arith.mulf %44, %52 : vector<8x1xf32>
    %c0_33 = arith.constant 0 : index
    %c0_34 = arith.constant 0 : index
    %54 = memref.load %arg13[%c0_33, %c0_34] : memref<1x1xf32, #tpu.memory_space<smem>>
    %55 = vector.broadcast %54 : f32 to vector<8x1xf32>
    %56 = arith.addf %53, %55 : vector<8x1xf32>
    %57 = arith.negf %56 : vector<8x1xf32>
    %58 = math.exp %57 : vector<8x1xf32>
    %cst_35 = arith.constant 1.000000e+00 : f32
    %59 = vector.broadcast %cst_35 : f32 to vector<8x1xf32>
    %60 = arith.addf %59, %58 : vector<8x1xf32>
    %61 = arith.divf %59, %60 : vector<8x1xf32>
    %62 = tpu.concatenate %61, %47, %50 in 1 : vector<8x1xf32>, vector<8x1xf32>, vector<8x1xf32> -> vector<8x3xf32>
    %c0_36 = arith.constant 0 : index
    %c0_37 = arith.constant 0 : index
    %63 = vector.load %arg14[%c0_36, %c0_37] : memref<8x3xf32, #tpu.memory_space<vmem>>, vector<8x3xf32>
    tpu.vector_store %arg14[%c0_36, %c0_37], %62 {strides = array<i32>} : memref<8x3xf32, #tpu.memory_space<vmem>>, vector<8x3xf32>,
    return
  }
  func.func @transform_0(%arg0: i32) -> (i32, i32) {
    %c0_i32 = arith.constant 0 : i32
    %c0_i32_0 = arith.constant 0 : i32
    return %arg0, %c0_i32 : i32, i32
  }
  func.func @transform_1(%arg0: i32) -> (i32, i32) {
    %c0_i32 = arith.constant 0 : i32
    %c0_i32_0 = arith.constant 0 : i32
    return %arg0, %c0_i32 : i32, i32
  }
  func.func @transform_2(%arg0: i32) -> (i32, i32) {
    %c0_i32 = arith.constant 0 : i32
    %c0_i32_0 = arith.constant 0 : i32
    return %arg0, %c0_i32 : i32, i32
  }
  func.func @transform_3(%arg0: i32) -> (i32, i32) {
    %c0_i32 = arith.constant 0 : i32
    %c0_i32_0 = arith.constant 0 : i32
    %c0_i32_1 = arith.constant 0 : i32
    return %c0_i32, %c0_i32_0 : i32, i32
  }
  func.func @transform_4(%arg0: i32) -> (i32, i32) {
    %c0_i32 = arith.constant 0 : i32
    %c0_i32_0 = arith.constant 0 : i32
    %c0_i32_1 = arith.constant 0 : i32
    return %c0_i32, %c0_i32_0 : i32, i32
  }
  func.func @transform_5(%arg0: i32) -> (i32, i32) {
    %c0_i32 = arith.constant 0 : i32
    %c0_i32_0 = arith.constant 0 : i32
    %c0_i32_1 = arith.constant 0 : i32
    return %c0_i32, %c0_i32_0 : i32, i32
  }
  func.func @transform_6(%arg0: i32) -> (i32, i32) {
    %c0_i32 = arith.constant 0 : i32
    %c0_i32_0 = arith.constant 0 : i32
    %c0_i32_1 = arith.constant 0 : i32
    return %c0_i32, %c0_i32_0 : i32, i32
  }
  func.func @transform_7(%arg0: i32) -> (i32, i32) {
    %c0_i32 = arith.constant 0 : i32
    %c0_i32_0 = arith.constant 0 : i32
    %c0_i32_1 = arith.constant 0 : i32
    return %c0_i32, %c0_i32_0 : i32, i32
  }
  func.func @transform_8(%arg0: i32) -> (i32, i32) {
    %c0_i32 = arith.constant 0 : i32
    %c0_i32_0 = arith.constant 0 : i32
    %c0_i32_1 = arith.constant 0 : i32
    return %c0_i32, %c0_i32_0 : i32, i32
  }
  func.func @transform_9(%arg0: i32) -> (i32, i32) {
    %c0_i32 = arith.constant 0 : i32
    %c0_i32_0 = arith.constant 0 : i32
    %c0_i32_1 = arith.constant 0 : i32
    return %c0_i32, %c0_i32_0 : i32, i32
  }
  func.func @transform_10(%arg0: i32) -> (i32, i32) {
    %c0_i32 = arith.constant 0 : i32
    %c0_i32_0 = arith.constant 0 : i32
    %c0_i32_1 = arith.constant 0 : i32
    return %c0_i32, %c0_i32_0 : i32, i32
  }
  func.func @transform_11(%arg0: i32) -> (i32, i32) {
    %c0_i32 = arith.constant 0 : i32
    %c0_i32_0 = arith.constant 0 : i32
    %c0_i32_1 = arith.constant 0 : i32
    return %c0_i32, %c0_i32_0 : i32, i32
  }
  func.func @transform_12(%arg0: i32) -> (i32, i32) {
    %c0_i32 = arith.constant 0 : i32
    %c0_i32_0 = arith.constant 0 : i32
    %c0_i32_1 = arith.constant 0 : i32
    return %c0_i32, %c0_i32_0 : i32, i32
  }
  func.func @transform_13(%arg0: i32) -> (i32, i32) {
    %c0_i32 = arith.constant 0 : i32
    %c0_i32_0 = arith.constant 0 : i32
    return %arg0, %c0_i32 : i32, i32
  }
}

</mosaic_0001>

<bundles_post_ra>
// kernel: tpu_custom_call.1
= control target key start
LH: loop header
LB: loop body
LE: loop exit
PB: predicated region body
PF: predicated region fallthrough
CT: control target
= control target key end

     0   :  { %vm133_vm0 = vcmask 1043456   ;;  %v928_v0 = vmov 0.0   ;;  %vm929_vm1 = vmmov 0   ;;  %vm129_vm2 = vcmask 359424   ;;  %s931_s26 = smov 6   ;;  %s1336_s4 = inlined_call_operand.vmem [shape: f32[300,32], index: 4, kind: input, shape index: {}]   ;;  %s1337_s1 = inlined_call_operand.vmem [shape: f32[8,300], index: 1, kind: input, shape index: {}]   ;;  %s1338_s3 = inlined_call_operand.vmem [shape: f32[300,32], index: 3, kind: input, shape index: {}]   ;;  %s1339_s0 = inlined_call_operand.vmem [shape: f32[8,300], index: 0, kind: input, shape index: {}]   ;;  %s1340_s5 = inlined_call_operand.vmem [shape: f32[3,32], index: 5, kind: input, shape index: {}]   ;;  %s1341_s2 = inlined_call_operand.vmem [shape: f32[8,3], index: 2, kind: input, shape index: {}]   ;;  %s1342_s7 = inlined_call_operand.vmem [shape: f32[32,16], index: 7, kind: input, shape index: {}]   ;;  %s1343_s6 = inlined_call_operand.vmem [shape: f32[1,32], index: 6, kind: input, shape index: {}]   ;;  %s1344_s9 = inlined_call_operand.vmem [shape: f32[16,9], index: 9, kind: input, shape index: {}]   ;;  %s1345_s8 = inlined_call_operand.vmem [shape: f32[1,16], index: 8, kind: input, shape index: {}]   ;;  %s1346_s10 = inlined_call_operand.vmem [shape: f32[1,9], index: 10, kind: input, shape index: {}]   ;;  %s1347_s11 = inlined_call_operand.<no memory space> [shape: f32[1,1], index: 11, kind: input, shape index: {}]   ;;  %s1348_s12 = inlined_call_operand.<no memory space> [shape: f32[1,1], index: 12, kind: input, shape index: {}]   ;;  %s1349_s13 = inlined_call_operand.vmem [shape: f32[8,3], index: 13, kind: output, shape index: {}]  }
   0x1   :  { %853 = vmatprep.subr.mxu1 %v928_v0  ;;  %v122_v1 = vld [vmem:[%s1336_s4 + $0xf8] sm:$0xff]  ;;  %v128_v2 = vld [vmem:[%s1336_s4 + $0x128] sm:$0xf]  ;;  %865 = vmatprep.mubr.msk.f32.mxu1 %vm929_vm1, %v928_v0  ;;  %v121_v4 = vld [vmem:[%s1336_s4 + $0xf0] sm:$0xff]  ;;  %vm428_vm3 = vcmask 1042432   ;;  %vm424_vm4 = vcmask 23552  }
   0x2   :  { %v106_v3 = vld [vmem:[%s1336_s4 + $0x78] sm:$0xff]  ;;  %759 = vmatprep.subr.mxu0 %v122_v1  ;;  %854 = vmatpush3.msk.msra.mxu1 %vm133_vm0, %v128_v2  ;;  %v127_v5 = vld [vmem:[%s1336_s4 + $0x120] sm:$0xff]  ;;  %v105_v6 = vld [vmem:[%s1336_s4 + $0x70] sm:$0xff]  ;;  %vm528_vm5 = vcmask 261120   ;;  %vm617_vm6 = vcmask 130048   ;;  %vm735_vm7 = vcmask 7168  }
   0x3   :  { %760 = vmatpush3.msra.mxu0 %v106_v3  ;;  %855 = vmatprep.subr.mxu1 %v928_v0  ;;  %v120_v7 = vld [vmem:[%s1336_s4 + $0xe8] sm:$0xff]  ;;  %v126_v8 = vld [vmem:[%s1336_s4 + $0x118] sm:$0xff]  ;;  %v119_v10 = vld [vmem:[%s1336_s4 + $0xe0] sm:$0xff]  ;;  %vm737_vm8 = vcmask 15360  }
   0x4   :  { %761 = vmatprep.subr.mxu0 %v121_v4  ;;  %856 = vmatpush3.msra.mxu1 %v127_v5  ;;  %v104_v9 = vld [vmem:[%s1336_s4 + $0x68] sm:$0xff]  ;;  %v125_v11 = vld [vmem:[%s1336_s4 + $0x110] sm:$0xff]  ;;  %v103_v12 = vld [vmem:[%s1336_s4 + $0x60] sm:$0xff] }
   0x5   :  { %762 = vmatpush3.msra.mxu0 %v105_v6  ;;  %857 = vmatprep.subr.mxu1 %v928_v0  ;;  %v118_v13 = vld [vmem:[%s1336_s4 + $0xd8] sm:$0xff]  ;;  %v124_v14 = vld [vmem:[%s1336_s4 + $0x108] sm:$0xff]  ;;  %v117_v16 = vld [vmem:[%s1336_s4 + $0xd0] sm:$0xff] }
   0x6   :  { %763 = vmatprep.subr.mxu0 %v120_v7  ;;  %858 = vmatpush3.msra.mxu1 %v126_v8  ;;  %v102_v15 = vld [vmem:[%s1336_s4 + $0x58] sm:$0xff]  ;;  %v123_v17 = vld [vmem:[%s1336_s4 + $0x100] sm:$0xff]  ;;  %v101_v18 = vld [vmem:[%s1336_s4 + $0x50] sm:$0xff] }
   0x7   :  { %764 = vmatpush3.msra.mxu0 %v104_v9  ;;  %859 = vmatprep.subr.mxu1 %v928_v0  ;;  %v90_v19 = vld [vmem:[%s1337_s1 + $0x10] sm:$0xff]  ;;  %v81_v20 = vld [vmem:[%s1338_s3 + $0xf8] sm:$0xff]  ;;  %v116_v21 = vld [vmem:[%s1336_s4 + $0xc8] sm:$0xff] }
   0x8   :  { %765 = vmatprep.subr.mxu0 %v119_v10  ;;  %860 = vmatpush3.msra.mxu1 %v125_v11  ;;  %v65_v22 = vld [vmem:[%s1338_s3 + $0x78] sm:$0xff]  ;;  %v100_v23 = vld [vmem:[%s1336_s4 + $0x48] sm:$0xff]  ;;  %v80_v24 = vld [vmem:[%s1338_s3 + $0xf0] sm:$0xff] }
   0x9   :  { %766 = vmatpush3.msra.mxu0 %v103_v12  ;;  %861 = vmatprep.subr.mxu1 %v928_v0  ;;  %v115_v25 = vld [vmem:[%s1336_s4 + $0xc0] sm:$0xff]  ;;  %v64_v26 = vld [vmem:[%s1338_s3 + $0x70] sm:$0xff]  ;;  %v79_v28 = vld [vmem:[%s1338_s3 + $0xe8] sm:$0xff] }
   0xa   :  { %767 = vmatprep.subr.mxu0 %v118_v13  ;;  %862 = vmatpush3.msra.mxu1 %v124_v14  ;;  %v99_v27 = vld [vmem:[%s1336_s4 + $0x40] sm:$0xff]  ;;  %v114_v29 = vld [vmem:[%s1336_s4 + $0xb8] sm:$0xff]  ;;  %v63_v30 = vld [vmem:[%s1338_s3 + $0x68] sm:$0xff] }
   0xb   :  { %768 = vmatpush3.msra.mxu0 %v102_v15  ;;  %863 = vmatprep.subr.mxu1 %v928_v0  ;;  %v98_v31 = vld [vmem:[%s1336_s4 + $0x38] sm:$0xff]  ;;  %v78_v32 = vld [vmem:[%s1338_s3 + $0xe0] sm:$0xff]  ;;  %v113_v33 = vld [vmem:[%s1336_s4 + $0xb0] sm:$0xff] }
   0xc   :  { %769 = vmatprep.subr.mxu0 %v117_v16  ;;  %864 = vmatpush3.msra.mxu1 %v123_v17  ;;  %v62_v34 = vld [vmem:[%s1338_s3 + $0x60] sm:$0xff]  ;;  %v97_v35 = vld [vmem:[%s1336_s4 + $0x30] sm:$0xff]  ;;  %v77_v36 = vld [vmem:[%s1338_s3 + $0xd8] sm:$0xff] }
   0xd   :  { %770 = vmatpush3.msra.mxu0 %v101_v18  ;;  %866 = vmatmul.mubr.msk.f32.vlgmr.msra.gmra.mxu1 %vm129_vm2, %v90_v19  ;;  %v112_v37 = vld [vmem:[%s1336_s4 + $0xa8] sm:$0xff]  ;;  %v61_v38 = vld [vmem:[%s1338_s3 + $0x58] sm:$0xff]  ;;  %v76_v40 = vld [vmem:[%s1338_s3 + $0xd0] sm:$0xff] }
   0xe   :  { %801 = vmatprep.subr.mxu1 %v81_v20  ;;  %771 = vmatprep.subr.mxu0 %v116_v21  ;;  %v96_v39 = vld [vmem:[%s1336_s4 + $0x28] sm:$0xff]  ;;  %v111_v41 = vld [vmem:[%s1336_s4 + $0xa0] sm:$0xff]  ;;  %v60_v42 = vld [vmem:[%s1338_s3 + $0x50] sm:$0xff] }
   0xf   :  { %802 = vmatpush3.msra.mxu1 %v65_v22  ;;  %772 = vmatpush3.msra.mxu0 %v100_v23  ;;  %v95_v43 = vld [vmem:[%s1336_s4 + $0x20] sm:$0xff]  ;;  %v75_v44 = vld [vmem:[%s1338_s3 + $0xc8] sm:$0xff]  ;;  %v110_v45 = vld [vmem:[%s1336_s4 + $0x98] sm:$0xff] }
  0x10   :  { %803 = vmatprep.subr.mxu1 %v80_v24  ;;  %773 = vmatprep.subr.mxu0 %v115_v25  ;;  %v59_v46 = vld [vmem:[%s1338_s3 + $0x48] sm:$0xff]  ;;  %v94_v47 = vld [vmem:[%s1336_s4 + $0x18] sm:$0xff]  ;;  %v74_v48 = vld [vmem:[%s1338_s3 + $0xc0] sm:$0xff] }
  0x11   :  { %804 = vmatpush3.msra.mxu1 %v64_v26  ;;  %774 = vmatpush3.msra.mxu0 %v99_v27  ;;  %v109_v49 = vld [vmem:[%s1336_s4 + $0x90] sm:$0xff]  ;;  %v58_v50 = vld [vmem:[%s1338_s3 + $0x40] sm:$0xff]  ;;  %v73_v52 = vld [vmem:[%s1338_s3 + $0xb8] sm:$0xff] }
  0x12   :  { %805 = vmatprep.subr.mxu1 %v79_v28  ;;  %775 = vmatprep.subr.mxu0 %v114_v29  ;;  %v93_v51 = vld [vmem:[%s1336_s4 + $0x10] sm:$0xff]  ;;  %v108_v53 = vld [vmem:[%s1336_s4 + $0x88] sm:$0xff]  ;;  %v57_v54 = vld [vmem:[%s1338_s3 + $0x38] sm:$0xff] }
  0x13   :  { %806 = vmatpush3.msra.mxu1 %v63_v30  ;;  %776 = vmatpush3.msra.mxu0 %v98_v31  ;;  %v92_v55 = vld [vmem:[%s1336_s4 + $0x8] sm:$0xff]  ;;  %v72_v56 = vld [vmem:[%s1338_s3 + $0xb0] sm:$0xff]  ;;  %v107_v57 = vld [vmem:[%s1336_s4 + $0x80] sm:$0xff] }
  0x14   :  { %807 = vmatprep.subr.mxu1 %v78_v32  ;;  %777 = vmatprep.subr.mxu0 %v113_v33  ;;  %v56_v58 = vld [vmem:[%s1338_s3 + $0x30] sm:$0xff]  ;;  %v91_v59 = vld [vmem:[%s1336_s4] sm:$0xff]  ;;  %v89_v60 = vld [vmem:[%s1337_s1 + $0x8] sm:$0xff] }
  0x15   :  { %808 = vmatpush3.msra.mxu1 %v62_v34  ;;  %778 = vmatpush3.msra.mxu0 %v97_v35  ;;  %v71_v61 = vld [vmem:[%s1338_s3 + $0xa8] sm:$0xff]  ;;  %v88_v62 = vld [vmem:[%s1337_s1] sm:$0xff]  ;;  %v69_v4 = vld [vmem:[%s1338_s3 + $0x98] sm:$0xff] }
  0x16   :  { %809 = vmatprep.subr.mxu1 %v77_v36  ;;  %779 = vmatprep.subr.mxu0 %v112_v37  ;;  %v55_v63 = vld [vmem:[%s1338_s3 + $0x28] sm:$0xff]  ;;  %v70_v1 = vld [vmem:[%s1338_s3 + $0xa0] sm:$0xff]  ;;  %v53_v5 = vld [vmem:[%s1338_s3 + $0x18] sm:$0xff] }
  0x17   :  { %810 = vmatpush3.msra.mxu1 %v61_v38  ;;  %780 = vmatpush3.msra.mxu0 %v96_v39  ;;  %v54_v2 = vld [vmem:[%s1338_s3 + $0x20] sm:$0xff]  ;;  %v87_v3 = vld [vmem:[%s1338_s3 + $0x128] sm:$0xf]  ;;  %v68_v7 = vld [vmem:[%s1338_s3 + $0x90] sm:$0xff] }
  0x18   :  { %811 = vmatprep.subr.mxu1 %v76_v40  ;;  %781 = vmatprep.subr.mxu0 %v111_v41  ;;  %v86_v6 = vld [vmem:[%s1338_s3 + $0x120] sm:$0xff]  ;;  %v52_v8 = vld [vmem:[%s1338_s3 + $0x10] sm:$0xff]  ;;  %v85_v9 = vld [vmem:[%s1338_s3 + $0x118] sm:$0xff] }
  0x19   :  { %812 = vmatpush3.msra.mxu1 %v60_v42  ;;  %782 = vmatpush3.msra.mxu0 %v95_v43  ;;  %v67_v10 = vld [vmem:[%s1338_s3 + $0x88] sm:$0xff]  ;;  %v84_v12 = vld [vmem:[%s1338_s3 + $0x110] sm:$0xff]  ;;  %v66_v13 = vld [vmem:[%s1338_s3 + $0x80] sm:$0xff] }
  0x1a   :  { %813 = vmatprep.subr.mxu1 %v75_v44  ;;  %783 = vmatprep.subr.mxu0 %v110_v45  ;;  %v51_v11 = vld [vmem:[%s1338_s3 + $0x8] sm:$0xff]  ;;  %v50_v14 = vld [vmem:[%s1338_s3] sm:$0xff]  ;;  %v49_v19 = vld [vmem:[%s1339_s0 + $0x10] sm:$0xff] }
  0x1b   :  { %814 = vmatpush3.msra.mxu1 %v59_v46  ;;  %784 = vmatpush3.msra.mxu0 %v94_v47  ;;  %v48_v15 = vld [vmem:[%s1339_s0 + $0x8] sm:$0xff]  ;;  %v47_v17 = vld [vmem:[%s1339_s0] sm:$0xff]  ;;  %v520_v22 = vld [vmem:[%s1342_s7 + $0x18] sm:$0xff] }
  0x1c   :  { %815 = vmatprep.subr.mxu1 %v74_v48  ;;  %785 = vmatprep.subr.mxu0 %v109_v49  ;;  %v83_v16 = vld [vmem:[%s1338_s3 + $0x108] sm:$0xff]  ;;  %v82_v18 = vld [vmem:[%s1338_s3 + $0x100] sm:$0xff]  ;;  %v519_v23 = vld [vmem:[%s1342_s7 + $0x10] sm:$0xff] }
  0x1d   :  { %816 = vmatpush3.msra.mxu1 %v58_v50  ;;  %786 = vmatpush3.msra.mxu0 %v93_v51  ;;  %v423_v20 = vld [vmem:[%s1340_s5] sm:$0x7]  ;;  %v518_v24 = vld [vmem:[%s1342_s7 + $0x8] sm:$0xff] }
  0x1e   :  { %817 = vmatprep.subr.mxu1 %v73_v52  ;;  %787 = vmatprep.subr.mxu0 %v108_v53  ;;  %v1280_v21 = vld [vmem:[%s1341_s2] sm:$0xff]  ;;  %v609_v48 = vld [vmem:[%s1344_s9 + $0x8] sm:$0xff] }
  0x1f   :  { %818 = vmatpush3.msra.mxu1 %v57_v54  ;;  %788 = vmatpush3.msra.mxu0 %v92_v55  ;;  %v517_v25 = vld [vmem:[%s1342_s7] sm:$0xff] }
  0x20   :  { %819 = vmatprep.subr.mxu1 %v72_v56  ;;  %789 = vmatprep.subr.mxu0 %v107_v57  ;;  %v750_v40 = vld [vmem:[%s1343_s6] ss:$0 sm:$0xff]  ;;  %s930_s6 = smov 3  }
  0x21   :  { %820 = vmatpush3.msra.mxu1 %v56_v58  ;;  %790 = vmatpush3.msra.mxu0 %v91_v59  ;;  %v608_v49 = vld [vmem:[%s1344_s9] sm:$0xff] }
  0x22   :  { %201 = vmatprep.mubr.f32.mxu0 %v89_v60  ;;  %821 = vmatprep.subr.mxu1 %v71_v61  ;;  %v752_v50 = vld [vmem:[%s1345_s8] ss:$0 sm:$0xff]  ;;  %s932_s8 = smov 125  }
  0x23   :  { %202 = vmatmul.mubr.f32.vlgmr.msra.gmra.mxu0 %v88_v62  ;;  %822 = vmatpush3.msra.mxu1 %v55_v63  ;;  %v755_v57 = vld [vmem:[%s1346_s10] ss:$0 sm:$0xff]  ;;  %s933_s10 = smov 122  }
  0x24   :  { %823 = vmatprep.subr.mxu1 %v70_v1  ;;  %868 = vmatprep.subr.mxu0 %v928_v0 }
  0x25   :  { %824 = vmatpush3.msra.mxu1 %v54_v2  ;;  %869 = vmatpush3.msk.msra.mxu0 %vm133_vm0, %v87_v3 }
  0x26   :  { %825 = vmatprep.subr.mxu1 %v69_v4  ;;  %870 = vmatprep.subr.mxu0 %v928_v0 }
  0x27   :  { %826 = vmatpush3.msra.mxu1 %v53_v5  ;;  %871 = vmatpush3.msra.mxu0 %v86_v6 }
  0x28   :  { %827 = vmatprep.subr.mxu1 %v68_v7  ;;  %872 = vmatprep.subr.mxu0 %v928_v0 }
  0x29   :  { %828 = vmatpush3.msra.mxu1 %v52_v8  ;;  %873 = vmatpush3.msra.mxu0 %v85_v9 }
  0x2a   :  { %829 = vmatprep.subr.mxu1 %v67_v10  ;;  %874 = vmatprep.subr.mxu0 %v928_v0 }
  0x2b   :  { %830 = vmatpush3.msra.mxu1 %v51_v11  ;;  %875 = vmatpush3.msra.mxu0 %v84_v12  ;;  %v724_v12 = vstv %s1347_s11 }
  0x2c   :  { %831 = vmatprep.subr.mxu1 %v66_v13  ;;  %876 = vmatprep.subr.mxu0 %v928_v0 }
  0x2d   :  { %832 = vmatpush3.msra.mxu1 %v50_v14  ;;  %347 = vmatprep.mubr.f32.mxu1 %v48_v15  ;;  %v727_v15 = vstv %s1348_s12 }
  0x2e   :  { %877 = vmatpush3.msra.mxu0 %v83_v16  ;;  %348 = vmatmul.mubr.f32.vlgmr.msra.gmra.mxu1 %v47_v17 }
  0x2f   :  { %878 = vmatprep.subr.mxu0 %v928_v0  ;;  %880 = vmatprep.mubr.msk.f32.mxu0 %vm929_vm1, %v928_v0 }
  0x30   :  { %879 = vmatpush3.msra.mxu0 %v82_v18  ;;  %888 = vmatprep.subr.mxu1 %v928_v0 }
  0x31   :  { %881 = vmatmul.mubr.msk.f32.vlgmr.msra.gmra.mxu0 %vm129_vm2, %v49_v19  ;;  %883 = vmatprep.subr.mxu0 %v928_v0 }
  0x32   :  { %884 = vmatpush3.msk.msra.mxu0 %vm428_vm3, %v423_v20  ;;  %885 = vmatprep.mubr.msk.f32.mxu0 %vm929_vm1, %v928_v0 }
  0x33   :  { %896 = vmatprep.mubr.msk.f32.mxu1 %vm929_vm1, %v928_v0  ;;  %899 = vmatprep.subr.mxu0 %v928_v0 }
  0x34   :  { %889 = vmatpush3.msra.mxu1 %v520_v22  ;;  %701 = vrot.lane.b32.xlu0 %v1280_v21, %s930_s6 }
  0x35   :  { %886 = vmatmul.mubr.msk.f32.vlgmr.msra.gmra.mxu0 %vm424_vm4, %v1280_v21  ;;  %890 = vmatprep.subr.mxu1 %v928_v0 }
  0x36   :  { %903 = vmatprep.mubr.msk.f32.mxu0 %vm929_vm1, %v928_v0  ;;  %891 = vmatpush3.msra.mxu1 %v519_v23 }
  0x37   :  { %892 = vmatprep.subr.mxu1 %v928_v0  ;;  %900 = vmatpush3.msra.mxu0 %v609_v48 }
  0x38   :  { %893 = vmatpush3.msra.mxu1 %v518_v24  ;;  %901 = vmatprep.subr.mxu0 %v928_v0 }
  0x39   :  { %894 = vmatprep.subr.mxu1 %v928_v0  ;;  %902 = vmatpush3.msra.mxu0 %v608_v49 }
  0x3a   :  { %895 = vmatpush3.msra.mxu1 %v517_v25  ;;  %712 = vrot.lane.b32.xlu0 %v1280_v21, %s931_s26 }
  0xa6   :  { %v702_v1 = vpop.permute.xlu0 %701 }
  0xac   :  { %v713_v5 = vpop.permute.xlu0 %712 }
  0xcd   :  { %v273_v26 = vpop.f32.mrf.mxu1 }
  0xcf   :  { %v867_v27 = vpop.f32.mrf.mxu1 }
  0xe3   :  { %v791_v28 = vpop.f32.mrf.mxu0 }
  0xe5   :  { %v792_v29 = vpop.f32.mrf.mxu0 }
  0xe6   :  { %v793_v30 = vadd.f32 %v792_v29, %v791_v28 }
  0xe8   :  { %v274_v33 = vadd.f32 %v793_v30, %v273_v26 }
  0xee   :  { %v833_v31 = vpop.f32.mrf.mxu1 }
  0xf0   :  { %v834_v32 = vpop.f32.mrf.mxu1 }
  0xf1   :  { %v835_v34 = vadd.f32 %v834_v32, %v833_v31  ;;  %v419_v35 = vpop.f32.mrf.mxu0 }
  0xf3   :  { %v350_v36 = vadd.f32 %v835_v34, %v274_v33  ;;  %v882_v37 = vpop.f32.mrf.mxu0 }
  0xf5   :  { %v420_v38 = vadd.f32 %v419_v35, %v350_v36  ;;  %v498_v39 = vpop.f32.mrf.mxu0 }
  0xf7   :  { %v502_v41 = vadd.f32 %v498_v39, %v420_v38  ;;  %v887_v42 = vpop.f32.mrf.mxu0 }
  0xf9   :  { %v510_v43 = vadd.f32 %v750_v40, %v502_v41 }
  0xfb   :  { %v751_v44 = vmul.f32 -1.442695, %v510_v43 }
  0xfd   :  { %912 = vpow2.f32 %v751_v44 }
 0x10a   :  { %v913_v45 = vpop.eup %912 }
 0x10b   :  { %v514_v46 = vadd.f32 1.0, %v913_v45 }
 0x10d   :  { %914 = vrcp.f32 %v514_v46 }
 0x11a   :  { %v915_v47 = vpop.eup %914 }
 0x11b   :  { %897 = vmatmul.mubr.msk.f32.vlgmr.msra.gmra.mxu1 %vm528_vm5, %v915_v47 }
 0x1db   :  { %v598_v51 = vpop.f32.mrf.mxu1 }
 0x1dc   :  { %v599_v52 = vadd.f32 %v752_v50, %v598_v51 }
 0x1dd   :  { %v898_v53 = vpop.f32.mrf.mxu1 }
 0x1de   :  { %v754_v54 = vmul.f32 -1.442695, %v599_v52 }
 0x1e0   :  { %916 = vpow2.f32 %v754_v54 }
 0x1ed   :  { %v917_v55 = vpop.eup %916 }
 0x1ee   :  { %v605_v56 = vadd.f32 1.0, %v917_v55 }
 0x1f0   :  { %918 = vrcp.f32 %v605_v56 }
 0x1fd   :  { %v919_v0 = vpop.eup %918 }
 0x1fe   :  { %904 = vmatmul.mubr.msk.f32.vlgmr.msra.gmra.mxu0 %vm617_vm6, %v919_v0 }
 0x2be   :  { %v687_v58 = vpop.f32.mrf.mxu0 }
 0x2bf   :  { %v688_v59 = vadd.f32 %v755_v57, %v687_v58 }
 0x2c0   :  { %v905_v60 = vpop.f32.mrf.mxu0 }
 0x2c1   :  { %v757_v61 = vmul.f32 -1.442695, %v688_v59 }
 0x2c3   :  { %920 = vpow2.f32 %v757_v61 }
 0x2d0   :  { %v921_v62 = vpop.eup %920 }
 0x2d1   :  { %v694_v63 = vadd.f32 1.0, %v921_v62 }
 0x2d3   :  { %922 = vrcp.f32 %v694_v63 }
 0x2e0   :  { %v923_v2 = vpop.eup %922 }
 0x2e1   :  { %v704_v3 = vmul.f32 %v923_v2, %v702_v1  ;;  %v697_v4 = vmul.f32 %v923_v2, %v1280_v21  ;;  %v715_v7 = vmul.f32 %v923_v2, %v713_v5 }
 0x2e3   :  { %706 = vrot.lane.b32.xlu1 %v704_v3, %s932_s8  ;;  %v698_v6 = vsel %vm424_vm4, %v697_v4, 0.0 }
 0x2e4   :  { %699 = vadd.xlane.f32.xlu0 %v698_v6 }
 0x2e7   :  { %717 = vrot.lane.b32.xlu1 %v715_v7, %s933_s10 }
 0x355   :  { %v707_v8 = vpop.permute.xlu1 %706 }
 0x356   :  { %v709_v9 = vsel %vm424_vm4, %v707_v8, 0.0 }
 0x357   :  { %710 = vadd.xlane.f32.xlu1 %v709_v9 }
 0x359   :  { %v718_v10 = vpop.permute.xlu1 %717 }
 0x35a   :  { %v720_v11 = vsel %vm424_vm4, %v718_v10, 0.0 }
 0x35b   :  { %721 = vadd.xlane.f32.xlu0 %v720_v11 }
 0x36d   :  { %v700_v13 = vpop.xlane.xlu0 %699 }
 0x36e   :  { %v725_v14 = vmul.f32 %v724_v12, %v700_v13 }
 0x370   :  { %v728_v16 = vadd.f32 %v727_v15, %v725_v14 }
 0x372   :  { %v758_v17 = vmul.f32 -1.442695, %v728_v16 }
 0x374   :  { %924 = vpow2.f32 %v758_v17 }
 0x381   :  { %v925_v18 = vpop.eup %924 }
 0x382   :  { %v732_v19 = vadd.f32 1.0, %v925_v18 }
 0x384   :  { %926 = vrcp.f32 %v732_v19 }
 0x391   :  { %v927_v21 = vpop.eup %926 }
 0x3e0   :  { %v711_v20 = vpop.xlane.xlu1 %710 }
 0x3e1   :  { %v736_v22 = vsel %vm735_vm7, %v927_v21, %v711_v20 }
 0x3e4   :  { %v722_v23 = vpop.xlane.xlu0 %721 }
 0x3e5   :  { %v738_v24 = vsel %vm737_vm8, %v736_v22, %v722_v23 }
 0x3e6   :  { %739 = vst.msk [vmem:[%s1349_s13] sm:$0xff] %vm424_vm4, %v738_v24 }

</bundles_post_ra>
